<compile_context>
chip_gen: v7x
topology: tpu7x:2x2x1
jax: 0.10.0
libtpu: 0.0.40
codegen_flags: <defaults>
</compile_context>

<pallas_src>
import functools

import jax
import jax.numpy as jnp
from jax.experimental import pallas as pl
from jax.experimental.pallas import tpu as pltpu

_LANE = 128
_SUBLANE = 8
_MASK_NEG = -1e30  # finite "-inf" for padded softmax lanes (avoids inf-inf NaNs)


def _round_up(n, m):
    return ((n + m - 1) // m) * m


def grounder_kernel(x_ref, w1_ref, b1_ref, w2_ref, b2_ref, w3_ref, b3_ref, o_ref):
    """Fused 3-layer MLP + temperature softmax on one batch tile.

    Weights/biases are VMEM-resident across grid steps (constant index_maps).
    w3/b3 are pre-scaled by 1/temp; padded b3 lanes hold -1e30 (softmax mask).
    Matmuls accumulate in f32; tanh/exp/softmax run in f32.
    """
    cdt = w1_ref.dtype
    x = x_ref[...].astype(cdt)  # (TB, num_inputs) cast to compute dtype in-VMEM

    # Layer 1: Linear + Tanh  (Dropout(0.2) -> identity)
    h1 = jnp.dot(x, w1_ref[...], preferred_element_type=jnp.float32) + b1_ref[...]
    h1 = jnp.tanh(h1)

    # Layer 2: Linear  (Dropout(0.2) -> identity)
    h2 = jnp.dot(h1.astype(cdt), w2_ref[...],
                 preferred_element_type=jnp.float32) + b2_ref[...]

    # Layer 3: Linear (already scaled by 1/temp; padded lanes masked via b3)
    z = jnp.dot(h2.astype(cdt), w3_ref[...],
                preferred_element_type=jnp.float32) + b3_ref[...]

    # Numerically-stable softmax over the last (lane) axis.
    z = z - jnp.max(z, axis=-1, keepdims=True)
    e = jnp.exp(z)
    denom = jnp.sum(e, axis=-1, keepdims=True)
    o_ref[...] = (e * pl.reciprocal(denom, approx=True)).astype(o_ref.dtype)


def pack_params(params, temp=1.0, compute_dtype=jnp.bfloat16):
    """One-time padding / casting / scaling of the module parameters.

    Done once and reused across forward calls so the per-call wrapper adds no
    HBM pad passes. w1 keeps an unpadded K dim; w3/b3 absorb 1/temp; padded b3
    lanes carry the softmax mask.
    """
    f32 = jnp.float32
    num_inputs, hidden = params["w1"].shape
    num_output = params["w3"].shape[1]
    hid_p = _round_up(hidden, _LANE)
    out_p = _round_up(num_output, _LANE)
    inv_temp = jnp.asarray(1.0 / temp, f32)

    w1 = jnp.zeros((num_inputs, hid_p), compute_dtype).at[:, :hidden].set(
        params["w1"].astype(compute_dtype))
    b1 = jnp.zeros((1, hid_p), f32).at[:, :hidden].set(params["b1"].astype(f32))
    w2 = jnp.zeros((hid_p, hid_p), compute_dtype).at[:hidden, :hidden].set(
        params["w2"].astype(compute_dtype))
    b2 = jnp.zeros((1, hid_p), f32).at[:, :hidden].set(params["b2"].astype(f32))
    # Fold 1/temp into the last layer; bake the lane mask into b3.
    w3 = jnp.zeros((hid_p, out_p), compute_dtype).at[:hidden, :num_output].set(
        (params["w3"].astype(f32) * inv_temp).astype(compute_dtype))
    b3 = jnp.full((1, out_p), _MASK_NEG, f32).at[:, :num_output].set(
        params["b3"].astype(f32) * inv_temp)

    return {
        "w1": w1, "b1": b1, "w2": w2, "b2": b2, "w3": w3, "b3": b3,
        "num_inputs": num_inputs, "num_output": num_output,
        "hid_p": hid_p, "out_p": out_p,
    }


def _batch_tiling(batch, max_batch_tile):
    """Balanced batch tiles; even grid >= 2 for large batches (v7x dual TC)."""
    grid_n = pl.cdiv(batch, max_batch_tile)
    if batch > 1024:
        grid_n = max(grid_n, 2)
        grid_n += grid_n % 2  # even tile count -> both TensorCores fed
    tb = _round_up(pl.cdiv(batch, grid_n), _SUBLANE)
    batch_p = grid_n * tb
    return grid_n, tb, batch_p


def linear_grounder_forward(x, packed, max_batch_tile=2048):
    """x: [batch, num_inputs]; packed: output of pack_params. Returns
    [batch, num_output] probabilities in the packed compute dtype."""
    batch, num_inputs = x.shape
    assert num_inputs == packed["num_inputs"]
    num_output = packed["num_output"]
    hid_p, out_p = packed["hid_p"], packed["out_p"]
    cdt = packed["w1"].dtype

    grid_n, tb, batch_p = _batch_tiling(batch, max_batch_tile)

    # Row-only padding (no lane padding, no dtype-cast copy of x).
    if batch_p != batch:
        x = jnp.pad(x, ((0, batch_p - batch), (0, 0)))

    x_isz = jnp.dtype(x.dtype).itemsize
    w_isz = jnp.dtype(cdt).itemsize
    o_isz = jnp.dtype(cdt).itemsize
    w_bytes = (num_inputs * hid_p + hid_p * hid_p + hid_p * out_p) * w_isz
    b_bytes = (2 * hid_p + out_p) * 4

    # Advisory cost estimate for the XLA scheduler.
    flops = 2 * batch_p * (num_inputs * hid_p + hid_p * hid_p + hid_p * out_p)
    transcendentals = batch_p * (hid_p + out_p)  # tanh + exp
    bytes_accessed = batch_p * num_inputs * x_isz + w_bytes + b_bytes + batch_p * out_p * o_isz

    # Explicit scoped-VMEM limit (v5e default is only 16 MiB).
    vmem_est = (2 * tb * num_inputs * x_isz        # x double buffer
                + 2 * tb * out_p * o_isz           # out double buffer
                + w_bytes + b_bytes
                + 8 * tb * hid_p * 4)              # f32 intermediates headroom
    vmem_limit = int(min(max(2 * vmem_est, 16 * 1024 * 1024), 48 * 1024 * 1024))

    out_padded = pl.pallas_call(
        grounder_kernel,
        out_shape=jax.ShapeDtypeStruct((batch_p, out_p), cdt),
        grid=(grid_n,),
        in_specs=[
            pl.BlockSpec((tb, num_inputs), lambda i: (i, 0)),       # x tile (pipelined)
            pl.BlockSpec((num_inputs, hid_p), lambda i: (0, 0)),    # w1 (resident)
            pl.BlockSpec((1, hid_p), lambda i: (0, 0)),             # b1
            pl.BlockSpec((hid_p, hid_p), lambda i: (0, 0)),         # w2
            pl.BlockSpec((1, hid_p), lambda i: (0, 0)),             # b2
            pl.BlockSpec((hid_p, out_p), lambda i: (0, 0)),         # w3 (pre-scaled)
            pl.BlockSpec((1, out_p), lambda i: (0, 0)),             # b3 (scaled + mask)
        ],
        out_specs=pl.BlockSpec((tb, out_p), lambda i: (i, 0)),      # lane-dense output
        compiler_params=pltpu.CompilerParams(
            dimension_semantics=("parallel",),
            vmem_limit_bytes=vmem_limit),
        cost_estimate=pl.CostEstimate(
            flops=flops, transcendentals=transcendentals,
            bytes_accessed=bytes_accessed),
    )(x, packed["w1"], packed["b1"], packed["w2"], packed["b2"],
      packed["w3"], packed["b3"])

    return out_padded[:batch, :num_output]


def init_params(key, num_inputs, hidden_size, num_output):
    """Deterministic synthetic parameter init (same shapes as the PyTorch module)."""
    k1, k2, k3, k4, k5, k6 = jax.random.split(key, 6)
    s1 = 1.0 / jnp.sqrt(num_inputs)
    s2 = 1.0 / jnp.sqrt(hidden_size)
    return {
        "w1": jax.random.uniform(k1, (num_inputs, hidden_size), jnp.float32, -s1, s1),
        "b1": jax.random.uniform(k2, (1, hidden_size), jnp.float32, -s1, s1),
        "w2": jax.random.uniform(k3, (hidden_size, hidden_size), jnp.float32, -s2, s2),
        "b2": jax.random.uniform(k4, (1, hidden_size), jnp.float32, -s2, s2),
        "w3": jax.random.uniform(k5, (hidden_size, num_output), jnp.float32, -s2, s2),
        "b3": jax.random.uniform(k6, (1, num_output), jnp.float32, -s2, s2),
    }


def reference_forward(x, params, temp=1.0):
    """Pure-JAX f32 reference for correctness check."""
    h1 = jnp.tanh(x @ params["w1"] + params["b1"])
    h2 = h1 @ params["w2"] + params["b2"]
    logits = h2 @ params["w3"] + params["b3"]
    return jax.nn.softmax(logits / temp, axis=-1)


if __name__ == "__main__":
    key = jax.random.PRNGKey(0)
    kx, kb, kp = jax.random.split(key, 3)

    batch, num_inputs, hidden_size, num_output = 8, 32, 32, 16
    x = jax.random.normal(kx, (batch, num_inputs), dtype=jnp.float32)
    params = init_params(kp, num_inputs, hidden_size, num_output)
    temp = 2.0

    ref = reference_forward(x, params, temp=temp)

    # Default bf16-MXU path (f32 accumulation / transcendentals, bf16 output).
    packed = pack_params(params, temp=temp)
    out = jax.block_until_ready(linear_grounder_forward(x, packed))
    assert out.shape == (batch, num_output)
    out_f = out.astype(jnp.float32)
    assert jnp.allclose(out_f, ref, atol=3e-2, rtol=3e-2), "bf16 path mismatch vs reference"
    assert jnp.allclose(jnp.sum(out_f, axis=-1), 1.0, atol=1e-2), "softmax rows must sum to 1"

    # f32 compute path (tighter structural/numerical check).
    packed_f32 = pack_params(params, temp=temp, compute_dtype=jnp.float32)
    out_f32 = jax.block_until_ready(linear_grounder_forward(x, packed_f32))
    assert jnp.allclose(out_f32, ref, atol=5e-3, rtol=5e-3), "f32 path mismatch vs reference"
    assert jnp.allclose(jnp.sum(out_f32, axis=-1), 1.0, atol=1e-2)

    # Larger batch with a small tile cap: exercises grid > 1, balanced tiles,
    # and row-only batch padding (520 -> 3 tiles of 176 rows, 8 padded rows).
    big_batch = 520
    xb = jax.random.normal(kb, (big_batch, num_inputs), dtype=jnp.float32)
    out_big = jax.block_until_ready(
        linear_grounder_forward(xb, packed, max_batch_tile=192))
    ref_big = reference_forward(xb, params, temp=temp)
    assert out_big.shape == (big_batch, num_output)
    assert jnp.allclose(out_big.astype(jnp.float32), ref_big, atol=3e-2, rtol=3e-2), \
        "gridded path mismatch"
    assert jnp.allclose(jnp.sum(out_big.astype(jnp.float32), axis=-1), 1.0, atol=1e-2)

    print("KERNEL_OK")
</pallas_src>

<mosaic_0001>
module attributes {stable_mosaic.version = 11 : i64} {
  func.func @grounder_kernel(%arg0: i32, %arg1: memref<8x32xf32, #tpu.memory_space<vmem>>, %arg2: memref<32x128xbf16, #tpu.memory_space<vmem>>, %arg3: memref<1x128xf32, #tpu.memory_space<vmem>>, %arg4: memref<128x128xbf16, #tpu.memory_space<vmem>>, %arg5: memref<1x128xf32, #tpu.memory_space<vmem>>, %arg6: memref<128x128xbf16, #tpu.memory_space<vmem>>, %arg7: memref<1x128xf32, #tpu.memory_space<vmem>>, %arg8: memref<8x128xbf16, #tpu.memory_space<vmem>>) attributes {dimension_semantics = [#tpu.dimension_semantics<parallel>], iteration_bounds = array<i64: 1>, scalar_prefetch = 0 : i64, scratch_operands = 0 : i64, tpu.core_type = #tpu.core_type<tc>, window_params = [{transform_indices = @transform_0, window_bounds = array<i64: 8, 32>}, {pipeline_mode = #tpu.pipeline_mode<synchronous>, transform_indices = @transform_1, window_bounds = array<i64: 32, 128>}, {pipeline_mode = #tpu.pipeline_mode<synchronous>, transform_indices = @transform_2, window_bounds = array<i64: 1, 128>}, {pipeline_mode = #tpu.pipeline_mode<synchronous>, transform_indices = @transform_3, window_bounds = array<i64: 128, 128>}, {pipeline_mode = #tpu.pipeline_mode<synchronous>, transform_indices = @transform_4, window_bounds = array<i64: 1, 128>}, {pipeline_mode = #tpu.pipeline_mode<synchronous>, transform_indices = @transform_5, window_bounds = array<i64: 128, 128>}, {pipeline_mode = #tpu.pipeline_mode<synchronous>, transform_indices = @transform_6, window_bounds = array<i64: 1, 128>}, {transform_indices = @transform_7, window_bounds = array<i64: 8, 128>}]} {
    %c0 = arith.constant 0 : index
    %c0_0 = arith.constant 0 : index
    %0 = vector.load %arg1[%c0, %c0_0] : memref<8x32xf32, #tpu.memory_space<vmem>>, vector<8x32xf32>
    %1 = arith.truncf %0 : vector<8x32xf32> to vector<8x32xbf16>
    %c0_1 = arith.constant 0 : index
    %c0_2 = arith.constant 0 : index
    %2 = vector.load %arg2[%c0_1, %c0_2] : memref<32x128xbf16, #tpu.memory_space<vmem>>, vector<32x128xbf16>
    %cst = arith.constant dense<0.000000e+00> : vector<8x128xf32>
    %3 = tpu.matmul %1, %2, %cst {dimension_numbers = #tpu.dot_dimension_numbers<[1], [0], [0], [1], [0, 0, 1, 1], [], []>} : vector<8x32xbf16>, vector<32x128xbf16>, vector<8x128xf32> -> vector<8x128xf32>
    %c0_3 = arith.constant 0 : index
    %c0_4 = arith.constant 0 : index
    %4 = vector.load %arg3[%c0_3, %c0_4] : memref<1x128xf32, #tpu.memory_space<vmem>>, vector<1x128xf32>
    %5 = vector.broadcast %4 : vector<1x128xf32> to vector<8x128xf32>
    %6 = arith.addf %3, %5 : vector<8x128xf32>
    %7 = math.tanh %6 : vector<8x128xf32>
    %8 = arith.truncf %7 : vector<8x128xf32> to vector<8x128xbf16>
    %c0_5 = arith.constant 0 : index
    %c0_6 = arith.constant 0 : index
    %9 = vector.load %arg4[%c0_5, %c0_6] : memref<128x128xbf16, #tpu.memory_space<vmem>>, vector<128x128xbf16>
    %cst_7 = arith.constant dense<0.000000e+00> : vector<8x128xf32>
    %10 = tpu.matmul %8, %9, %cst_7 {dimension_numbers = #tpu.dot_dimension_numbers<[1], [0], [0], [1], [0, 0, 1, 1], [], []>} : vector<8x128xbf16>, vector<128x128xbf16>, vector<8x128xf32> -> vector<8x128xf32>
    %c0_8 = arith.constant 0 : index
    %c0_9 = arith.constant 0 : index
    %11 = vector.load %arg5[%c0_8, %c0_9] : memref<1x128xf32, #tpu.memory_space<vmem>>, vector<1x128xf32>
    %12 = vector.broadcast %11 : vector<1x128xf32> to vector<8x128xf32>
    %13 = arith.addf %10, %12 : vector<8x128xf32>
    %14 = arith.truncf %13 : vector<8x128xf32> to vector<8x128xbf16>
    %c0_10 = arith.constant 0 : index
    %c0_11 = arith.constant 0 : index
    %15 = vector.load %arg6[%c0_10, %c0_11] : memref<128x128xbf16, #tpu.memory_space<vmem>>, vector<128x128xbf16>
    %cst_12 = arith.constant dense<0.000000e+00> : vector<8x128xf32>
    %16 = tpu.matmul %14, %15, %cst_12 {dimension_numbers = #tpu.dot_dimension_numbers<[1], [0], [0], [1], [0, 0, 1, 1], [], []>} : vector<8x128xbf16>, vector<128x128xbf16>, vector<8x128xf32> -> vector<8x128xf32>
    %c0_13 = arith.constant 0 : index
    %c0_14 = arith.constant 0 : index
    %17 = vector.load %arg7[%c0_13, %c0_14] : memref<1x128xf32, #tpu.memory_space<vmem>>, vector<1x128xf32>
    %18 = vector.broadcast %17 : vector<1x128xf32> to vector<8x128xf32>
    %19 = arith.addf %16, %18 : vector<8x128xf32>
    %cst_15 = arith.constant dense<0xFF800000> : vector<8xf32>
    %20 = vector.multi_reduction <maximumf>, %19, %cst_15 [1] : vector<8x128xf32> to vector<8xf32>
    %21 = vector.shape_cast %20 : vector<8xf32> to vector<8x1xf32>
    %22 = vector.broadcast %21 : vector<8x1xf32> to vector<8x128xf32>
    %23 = arith.subf %19, %22 : vector<8x128xf32>
    %24 = math.exp %23 : vector<8x128xf32>
    %cst_16 = arith.constant dense<0.000000e+00> : vector<8xf32>
    %25 = vector.multi_reduction <add>, %24, %cst_16 [1] : vector<8x128xf32> to vector<8xf32>
    %26 = vector.shape_cast %25 : vector<8xf32> to vector<8x1xf32>
    %27 = tpu.reciprocal %26 {approx = true} : vector<8x1xf32> -> vector<8x1xf32>
    %28 = vector.broadcast %27 : vector<8x1xf32> to vector<8x128xf32>
    %29 = arith.mulf %24, %28 : vector<8x128xf32>
    %30 = arith.truncf %29 : vector<8x128xf32> to vector<8x128xbf16>
    %c0_17 = arith.constant 0 : index
    %c0_18 = arith.constant 0 : index
    %31 = vector.load %arg8[%c0_17, %c0_18] : memref<8x128xbf16, #tpu.memory_space<vmem>>, vector<8x128xbf16>
    tpu.vector_store %arg8[%c0_17, %c0_18], %30 {strides = array<i32>} : memref<8x128xbf16, #tpu.memory_space<vmem>>, vector<8x128xbf16>,
    return
  }
  func.func @transform_0(%arg0: i32) -> (i32, i32) {
    %c0_i32 = arith.constant 0 : i32
    %c0_i32_0 = arith.constant 0 : i32
    return %arg0, %c0_i32 : i32, i32
  }
  func.func @transform_1(%arg0: i32) -> (i32, i32) {
    %c0_i32 = arith.constant 0 : i32
    %c0_i32_0 = arith.constant 0 : i32
    %c0_i32_1 = arith.constant 0 : i32
    return %c0_i32, %c0_i32_0 : i32, i32
  }
  func.func @transform_2(%arg0: i32) -> (i32, i32) {
    %c0_i32 = arith.constant 0 : i32
    %c0_i32_0 = arith.constant 0 : i32
    %c0_i32_1 = arith.constant 0 : i32
    return %c0_i32, %c0_i32_0 : i32, i32
  }
  func.func @transform_3(%arg0: i32) -> (i32, i32) {
    %c0_i32 = arith.constant 0 : i32
    %c0_i32_0 = arith.constant 0 : i32
    %c0_i32_1 = arith.constant 0 : i32
    return %c0_i32, %c0_i32_0 : i32, i32
  }
  func.func @transform_4(%arg0: i32) -> (i32, i32) {
    %c0_i32 = arith.constant 0 : i32
    %c0_i32_0 = arith.constant 0 : i32
    %c0_i32_1 = arith.constant 0 : i32
    return %c0_i32, %c0_i32_0 : i32, i32
  }
  func.func @transform_5(%arg0: i32) -> (i32, i32) {
    %c0_i32 = arith.constant 0 : i32
    %c0_i32_0 = arith.constant 0 : i32
    %c0_i32_1 = arith.constant 0 : i32
    return %c0_i32, %c0_i32_0 : i32, i32
  }
  func.func @transform_6(%arg0: i32) -> (i32, i32) {
    %c0_i32 = arith.constant 0 : i32
    %c0_i32_0 = arith.constant 0 : i32
    %c0_i32_1 = arith.constant 0 : i32
    return %c0_i32, %c0_i32_0 : i32, i32
  }
  func.func @transform_7(%arg0: i32) -> (i32, i32) {
    %c0_i32 = arith.constant 0 : i32
    %c0_i32_0 = arith.constant 0 : i32
    return %arg0, %c0_i32 : i32, i32
  }
}

</mosaic_0001>

<bundles_post_ra>
// kernel: tpu_custom_call.1
= control target key start
LH: loop header
LB: loop body
LE: loop exit
PB: predicated region body
PF: predicated region fallthrough
CT: control target
= control target key end

     0   :  { %12 = vsyncpa [#allocation3], 0  ;;  %s775_s0 = inlined_call_operand.hbm [shape: f32[8,32], index: 0, kind: input, shape index: {}]   ;;  %s776_s1 = inlined_call_operand.hbm [shape: bf16[32,128], index: 1, kind: input, shape index: {}]   ;;  %s777_s2 = inlined_call_operand.vmem [shape: f32[1,128], index: 2, kind: input, shape index: {}]   ;;  %s778_s3 = inlined_call_operand.hbm [shape: bf16[128,128], index: 3, kind: input, shape index: {}]   ;;  %s779_s4 = inlined_call_operand.vmem [shape: f32[1,128], index: 4, kind: input, shape index: {}]   ;;  %s780_s5 = inlined_call_operand.hbm [shape: bf16[128,128], index: 5, kind: input, shape index: {}]   ;;  %s781_s6 = inlined_call_operand.vmem [shape: f32[1,128], index: 6, kind: input, shape index: {}]   ;;  %s782_s7 = inlined_call_operand.hbm [shape: bf16[8,128], index: 7, kind: output, shape index: {}]  }
   0x1   :  { %13 = vsyncpa [#allocation6], 0 }
   0x2   :  { %14 = vsyncpa [#allocation9], 0 }
   0x3   :  { %15 = vsyncpa [#allocation4], 0  ;;  %s645_s24 = smov [#allocation5]   ;;  %s527_s28 = scalar_lea.hbm %s776_s1, 256 }
   0x4   :  { %s31_s25 = sshll.u32 %s645_s24, 4  ;;  %p528_p0 = scmp.ne.s32.totalorder %s776_s1, %s527_s28  ;;  %s32_s25 = int_to_ptr.vmem [resolvable:$true] %s31_s25 }
   0x5   :  { %p531_p1 = scmp.lt.u32.totalorder %s527_s28, %s776_s1 }
   0x7   :  { %p533_p2 = pnand %p531_p1, %p528_p0 }
   0x9   :  { %536 = shalt.err (!%p533_p2)
}
   0xa   :  { %s537_s10 = scalar_lea.vmem %s32_s25, 256  ;;  %p542_p4 = scmp.lt.s32.totalorder %s32_s25, %s32_s25 }
   0xb   :  { %p538_p3 = scmp.ne.s32.totalorder %s32_s25, %s537_s10  ;;  %p543_p5 = scmp.lt.s32.totalorder %s537_s10, %s537_s10 }
   0xd   :  { %p544_p6 = por %p543_p5, %p542_p4 }
   0xf   :  { %p545_p7 = pnand %p544_p6, %p538_p3 }
  0x11   :  { %548 = shalt.err (!%p545_p7)
}
  0x12   :  { %s646_s11 = smov 64   ;;  %s647_s12 = smov 4  }
  0x13   :  { %37 = dma.hbm_to_vmem [thread:$0]  %s776_s1, 256, %s32_s25, [#allocation6], %s646_s11, %s646_s11, %s647_s12  }
  0x14   :  { %s648_s15 = smov [#allocation2]   ;;  %s649_s17 = smov [#allocation7]  }
  0x15   :  { %s22_s16 = sshll.u32 %s648_s15, 4  ;;  %s45_s18 = sshll.u32 %s649_s17, 4  ;;  %s23_s16 = int_to_ptr.vmem [resolvable:$true] %s22_s16  ;;  %s46_s18 = int_to_ptr.vmem [resolvable:$true] %s45_s18 }
  0x16   :  { %s549_s21 = scalar_lea.hbm %s775_s0, 128 }
  0x17   :  { %p550_p8 = scmp.ne.s32.totalorder %s775_s0, %s549_s21  ;;  %p553_p9 = scmp.lt.u32.totalorder %s549_s21, %s775_s0 }
  0x19   :  { %p555_p10 = pnand %p553_p9, %p550_p8 }
  0x1b   :  { %558 = shalt.err (!%p555_p10)
}
  0x1c   :  { %s559_s1 = scalar_lea.vmem %s23_s16, 128  ;;  %p564_p12 = scmp.lt.s32.totalorder %s23_s16, %s23_s16 }
  0x1d   :  { %p560_p11 = scmp.ne.s32.totalorder %s23_s16, %s559_s1  ;;  %p565_p13 = scmp.lt.s32.totalorder %s559_s1, %s559_s1 }
  0x1f   :  { %p566_p0 = por %p565_p13, %p564_p12 }
  0x21   :  { %p567_p1 = pnand %p566_p0, %p560_p11 }
  0x23   :  { %570 = shalt.err (!%p567_p1)
}
  0x24   :  { %25 = dma.hbm_to_vmem [thread:$0]  %s775_s0, 128, %s23_s16, [#allocation3]  }
  0x25   :  { %s571_s30 = scalar_lea.hbm %s778_s3, 1024 }
  0x26   :  { %p572_p2 = scmp.ne.s32.totalorder %s778_s3, %s571_s30  ;;  %p575_p3 = scmp.lt.u32.totalorder %s571_s30, %s778_s3 }
  0x28   :  { %p577_p4 = pnand %p575_p3, %p572_p2 }
  0x2a   :  { %580 = shalt.err (!%p577_p4)
}
  0x2b   :  { %s581_s14 = scalar_lea.vmem %s46_s18, 1024  ;;  %p586_p6 = scmp.lt.s32.totalorder %s46_s18, %s46_s18 }
  0x2c   :  { %p582_p5 = scmp.ne.s32.totalorder %s46_s18, %s581_s14  ;;  %p587_p7 = scmp.lt.s32.totalorder %s581_s14, %s581_s14 }
  0x2e   :  { %p588_p8 = por %p587_p7, %p586_p6 }
  0x30   :  { %p589_p9 = pnand %p588_p8, %p582_p5 }
  0x32   :  { %592 = shalt.err (!%p589_p9)
}
  0x33   :  { %51 = dma.hbm_to_vmem [thread:$0]  %s778_s3, 1024, %s46_s18, [#allocation6], %s646_s11, %s646_s11, %s647_s12  }
  0x34   :  { %s650_s16 = smov [#allocation8]   ;;  %s593_s21 = scalar_lea.hbm %s780_s5, 1024 }
  0x35   :  { %s59_s17 = sshll.u32 %s650_s16, 4  ;;  %p594_p10 = scmp.ne.s32.totalorder %s780_s5, %s593_s21  ;;  %s60_s17 = int_to_ptr.vmem [resolvable:$true] %s59_s17 }
  0x36   :  { %p597_p11 = scmp.lt.u32.totalorder %s593_s21, %s780_s5 }
  0x38   :  { %p599_p12 = pnand %p597_p11, %p594_p10 }
  0x3a   :  { %602 = shalt.err (!%p599_p12)
}
  0x3b   :  { %s603_s1 = scalar_lea.vmem %s60_s17, 1024  ;;  %p608_p0 = scmp.lt.s32.totalorder %s60_s17, %s60_s17 }
  0x3c   :  { %p604_p13 = scmp.ne.s32.totalorder %s60_s17, %s603_s1  ;;  %p609_p1 = scmp.lt.s32.totalorder %s603_s1, %s603_s1 }
  0x3e   :  { %p610_p2 = por %p609_p1, %p608_p0 }
  0x40   :  { %p611_p3 = pnand %p610_p2, %p604_p13 }
  0x42   :  { %614 = shalt.err (!%p611_p3)
}
  0x43   :  { %65 = dma.hbm_to_vmem [thread:$0]  %s780_s5, 1024, %s60_s17, [#allocation9], %s646_s11, %s646_s11, %s647_s12  }
  0x44   :  { %637 = dma.done.wait [#allocation3], 128  }
  0x45   :  { %638 = vsyncadd [#allocation3], 4294967168 }
  0x46   :  { %639 = dma.done.wait [#allocation6], 1280  }
  0x47   :  { %640 = vsyncadd [#allocation6], 4294966016 }
  0x48   :  { %641 = dma.done.wait [#allocation9], 1024  }
  0x49   :  { %642 = vsyncadd [#allocation9], 4294966272  ;;  %v651_v0 = vmov 0.0   ;;  %vm652_vm0 = vmmov 0   ;;  %v503_v1 = vld [vmem:[#allocation5] sm:$0xff]   ;;  %v504_v2 = vld [vmem:[#allocation5 + $0x8] sm:$0xff]  }
  0x4a   :  { %446 = vmatprep.subr.bf16.mxu0 %v651_v0  ;;  %450 = vmatprep.mubr.msk.bf16.mxu0 %vm652_vm0, %v651_v0  ;;  %v81_v3 = vld [vmem:[#allocation2] sm:$0xff]  ;;  %v505_v4 = vld [vmem:[#allocation7] sm:$0xff]   ;;  %vm106_vm1 = vcmask 261120   ;;  %v507_v7 = vld [vmem:[#allocation7 + $0x10] sm:$0xff]  }
  0x4b   :  { %454 = vmatprep.subr.bf16.mxu1 %v651_v0  ;;  %470 = vmatprep.mubr.msk.bf16.mxu1 %vm652_vm0, %v651_v0  ;;  %v82_v5 = vpack.c.bf16 %v81_v3, %v81_v3  ;;  %v506_v6 = vld [vmem:[#allocation7 + $0x8] sm:$0xff]   ;;  %v508_v8 = vld [vmem:[#allocation7 + $0x18] sm:$0xff]   ;;  %v509_v9 = vld [vmem:[#allocation7 + $0x20] sm:$0xff]  }
  0x4c   :  { %447 = vmatpush3.bf16.msra.mxu0 %v503_v1  ;;  %455 = vmatpush3.bf16.msra.mxu1 %v505_v4  ;;  %v510_v10 = vld [vmem:[#allocation7 + $0x28] sm:$0xff]   ;;  %v511_v11 = vld [vmem:[#allocation7 + $0x30] sm:$0xff]   ;;  %v512_v12 = vld [vmem:[#allocation7 + $0x38] sm:$0xff]  }
  0x4d   :  { %448 = vmatprep.subr.bf16.mxu0 %v651_v0  ;;  %456 = vmatprep.subr.bf16.mxu1 %v651_v0  ;;  %v513_v13 = vld [vmem:[#allocation8] sm:$0xff]   ;;  %v514_v14 = vld [vmem:[#allocation8 + $0x8] sm:$0xff]   ;;  %v515_v15 = vld [vmem:[#allocation8 + $0x10] sm:$0xff]  }
  0x4e   :  { %v516_v16 = vld [vmem:[#allocation8 + $0x18] sm:$0xff]   ;;  %v517_v17 = vld [vmem:[#allocation8 + $0x20] sm:$0xff]   ;;  %v518_v18 = vld [vmem:[#allocation8 + $0x28] sm:$0xff]  }
  0x4f   :  { %v519_v19 = vld [vmem:[#allocation8 + $0x30] sm:$0xff]   ;;  %v403_v20 = vld [vmem:[%s777_s2] ss:$0 sm:$0xff]  ;;  %v520_v28 = vld [vmem:[#allocation8 + $0x38] sm:$0xff]  }
  0x50   :  { %449 = vmatpush3.bf16.msra.mxu0 %v504_v2  ;;  %457 = vmatpush3.bf16.msra.mxu1 %v506_v6  ;;  %v407_v29 = vld [vmem:[%s779_s4] ss:$0 sm:$0xff]  ;;  %s653_s4 = smov [#allocation10]  }
  0x51   :  { %474 = vmatprep.subr.bf16.mxu0 %v651_v0  ;;  %458 = vmatprep.subr.bf16.mxu1 %v651_v0  ;;  %v416_v36 = vld [vmem:[%s781_s6] ss:$0 sm:$0xff]  ;;  %s392_s28 = sshll.u32 %s653_s4, 4  ;;  %s393_s28 = int_to_ptr.vmem [resolvable:$true] %s392_s28 }
  0x52   :  { %s615_s6 = scalar_lea.vmem %s393_s28, 64  ;;  %p620_p5 = scmp.lt.s32.totalorder %s393_s28, %s393_s28 }
  0x53   :  { %451 = vmatmul.mubr.msk.bf16.vlgmr.msra.gmra.mrb[0].mxu0 %vm106_vm1, %v82_v5  ;;  %p616_p4 = scmp.ne.s32.totalorder %s393_s28, %s615_s6  ;;  %p621_p6 = scmp.lt.s32.totalorder %s615_s6, %s615_s6 }
  0x54   :  { %490 = vmatprep.mubr.msk.bf16.mxu0 %vm652_vm0, %v651_v0  ;;  %459 = vmatpush3.bf16.msra.mxu1 %v507_v7 }
  0x55   :  { %460 = vmatprep.subr.bf16.mxu1 %v651_v0  ;;  %475 = vmatpush3.bf16.msra.mxu0 %v513_v13  ;;  %p622_p7 = por %p621_p6, %p620_p5 }
  0x56   :  { %476 = vmatprep.subr.bf16.mxu0 %v651_v0 }
  0x57   :  { %p623_p8 = pnand %p622_p7, %p616_p4 }
  0x58   :  { %461 = vmatpush3.bf16.msra.mxu1 %v508_v8 }
  0x59   :  { %462 = vmatprep.subr.bf16.mxu1 %v651_v0  ;;  %477 = vmatpush3.bf16.msra.mxu0 %v514_v14 }
  0x5a   :  { %478 = vmatprep.subr.bf16.mxu0 %v651_v0 }
  0x5c   :  { %463 = vmatpush3.bf16.msra.mxu1 %v509_v9 }
  0x5d   :  { %464 = vmatprep.subr.bf16.mxu1 %v651_v0  ;;  %479 = vmatpush3.bf16.msra.mxu0 %v515_v15 }
  0x5e   :  { %480 = vmatprep.subr.bf16.mxu0 %v651_v0 }
  0x60   :  { %465 = vmatpush3.bf16.msra.mxu1 %v510_v10 }
  0x61   :  { %466 = vmatprep.subr.bf16.mxu1 %v651_v0  ;;  %481 = vmatpush3.bf16.msra.mxu0 %v516_v16 }
  0x62   :  { %482 = vmatprep.subr.bf16.mxu0 %v651_v0 }
  0x64   :  { %467 = vmatpush3.bf16.msra.mxu1 %v511_v11 }
  0x65   :  { %468 = vmatprep.subr.bf16.mxu1 %v651_v0  ;;  %483 = vmatpush3.bf16.msra.mxu0 %v517_v17 }
  0x66   :  { %484 = vmatprep.subr.bf16.mxu0 %v651_v0 }
  0x68   :  { %469 = vmatpush3.bf16.msra.mxu1 %v512_v12 }
  0x69   :  { %485 = vmatpush3.bf16.msra.mxu0 %v518_v18 }
  0x6a   :  { %486 = vmatprep.subr.bf16.mxu0 %v651_v0 }
  0x6d   :  { %487 = vmatpush3.bf16.msra.mxu0 %v519_v19 }
  0x6e   :  { %488 = vmatprep.subr.bf16.mxu0 %v651_v0 }
  0x71   :  { %489 = vmatpush3.bf16.msra.mxu0 %v520_v28 }
 0x126   :  { %v144_v21 = vpop.f32.mrb[0].mxu0 }
 0x127   :  { %v145_v22 = vadd.f32 %v403_v20, %v144_v21  ;;  %v452_v23 = vpop.f32.mrb[1].mxu0 }
 0x128   :  { %v147_v24 = vpop.f32.mrb[2].mxu0 }
 0x129   :  { %521 = vtanh.f32 %v145_v22  ;;  %v453_v25 = vpop.f32.mrb[3].mxu0 }
 0x133   :  { %v522_v26 = vpop.eup %521 }
 0x134   :  { %v151_v27 = vpack.c.bf16 %v522_v26, %v522_v26 }
 0x136   :  { %471 = vmatmul.mubr.bf16.vlgmr.msra.gmra.mrb[0].mxu1 %v151_v27 }
 0x209   :  { %v257_v30 = vpop.f32.mrb[0].mxu1 }
 0x20a   :  { %v258_v31 = vadd.f32 %v407_v29, %v257_v30  ;;  %v472_v32 = vpop.f32.mrb[1].mxu1 }
 0x20b   :  { %v260_v33 = vpop.f32.mrb[2].mxu1 }
 0x20c   :  { %v263_v34 = vpack.c.bf16 %v258_v31, %v258_v31  ;;  %v473_v35 = vpop.f32.mrb[3].mxu1 }
 0x20e   :  { %491 = vmatmul.mubr.bf16.vlgmr.msra.gmra.mrb[4].mxu0 %v263_v34 }
 0x2e1   :  { %v369_v37 = vpop.f32.mrb[4].mxu0 }
 0x2e2   :  { %v370_v38 = vadd.f32 %v416_v36, %v369_v37  ;;  %v492_v39 = vpop.f32.mrb[5].mxu0 }
 0x2e3   :  { %v372_v40 = vpop.f32.mrb[6].mxu0 }
 0x2e4   :  { %375 = vmax.xlane.f32.xlu0 %v370_v38  ;;  %v493_v41 = vpop.f32.mrb[7].mxu0 }
 0x371   :  { %v376_v42 = vpop.xlane.xlu0 %375 }
 0x372   :  { %v377_v43 = vsub.f32 %v370_v38, %v376_v42 }
 0x374   :  { %v378_v44 = vmul.f32 1.442695, %v377_v43 }
 0x376   :  { %523 = vpow2.f32 %v378_v44 }
 0x380   :  { %v524_v45 = vpop.eup %523 }
 0x381   :  { %380 = vadd.xlane.f32.xlu0 %v524_v45 }
 0x40e   :  { %v381_v46 = vpop.xlane.xlu0 %380 }
 0x40f   :  { %525 = vrcp.f32 %v381_v46 }
 0x419   :  { %v526_v47 = vpop.eup %525 }
 0x41a   :  { %v383_v48 = vmul.f32 %v526_v47, %v524_v45 }
 0x41c   :  { %v384_v49 = vpack.c.bf16 %v383_v48, %v383_v48 }
 0x41e   :  { %385 = vst [vmem:[#allocation10] sm:$0xf] %v384_v49 }
 0x41f   :  { %626 = shalt.err (!%p623_p8)
}
 0x420   :  { %s627_s8 = scalar_lea.hbm %s782_s7, 64 }
 0x421   :  { %p628_p9 = scmp.ne.s32.totalorder %s782_s7, %s627_s8  ;;  %p631_p10 = scmp.lt.u32.totalorder %s627_s8, %s782_s7 }
 0x423   :  { %p633_p11 = pnand %p631_p10, %p628_p9 }
 0x425   :  { %636 = shalt.err (!%p633_p11)
}
 0x426   :  { %395 = dma.vmem_to_hbm [thread:$0]  %s393_s28, 64, %s782_s7, [#allocation4]  }
 0x427   :  { %643 = dma.done.wait [#allocation4], 64  }
 0x428   :  { %644 = vsyncadd [#allocation4], 4294967232 }
 0x429   :  { %399 = vsyncpa [#allocation3], 1 }
 0x42a   :  { %400 = vsyncpa [#allocation6], 1 }
 0x42b   :  { %401 = vsyncpa [#allocation9], 1 }
 0x42c   :  { %402 = vsyncpa [#allocation4], 1 }

</bundles_post_ra>
